<compile_context>
chip_gen: v6e
topology: v6e:2x2x1
jax: 0.10.0
libtpu: 0.0.40
codegen_flags: <defaults>
</compile_context>

<pallas_src>
import jax
import jax.numpy as jnp
from jax.experimental import pallas as pl
from jax.experimental.pallas import tpu as pltpu

_EPS = 1e-5  # F.layer_norm default


def _make_kernel(h_real: int):
    inv_h = 1.0 / float(h_real)

    def layernorm_kernel(x_ref, w_ref, o_ref):
        # x_ref: (TM, Hpad) row tile; w_ref: (1, Hpad) resident weight.
        # Padded channels of x are zero, so s1/s2 over Hpad equal sums over H.
        x = x_ref[...].astype(jnp.float32)
        s1 = jnp.sum(x, axis=-1, keepdims=True)
        s2 = jnp.sum(x * x, axis=-1, keepdims=True)
        mean = s1 * inv_h
        var = jnp.maximum(s2 * inv_h - mean * mean, 0.0)
        xn = (x - mean) * jax.lax.rsqrt(var + _EPS)
        # Padded channels: weight is zero there -> output 0 (sliced off later).
        o_ref[...] = (xn * w_ref[...]).astype(o_ref.dtype)

    return layernorm_kernel


def _row_tile(rows: int, h_pad: int, x_bytes: int, o_bytes: int) -> int:
    """Row-tile size: large enough to amortize ~0.35us/step overhead, small
    enough that (a) the grid has >= ~8 steps (pipelining + v7x 2-TC sharding)
    and (b) the double-buffered in/out tiles fit a conservative VMEM budget."""
    min_steps = 8  # >= 2 * num_cores on v7x, gives real double-buffering
    tm = max(8, (min(512, rows // min_steps) // 8) * 8)
    # VMEM cap per step: 2 buffers x (in + out) + ~2 f32 intermediates.
    per_row = h_pad * (2 * (x_bytes + o_bytes) + 2 * 4)
    budget = 24 * 1024 * 1024
    tm_cap = max(8, ((budget // per_row) // 8) * 8)
    return min(tm, tm_cap)


def layer_norm(x, weight, out_dtype=None):
    """x: (B, L, H) float; weight: (H,). Returns (B, L, H).

    out_dtype defaults to float32 (matches the torch reference). Pass
    out_dtype=jnp.bfloat16 to halve writeback HBM traffic when the consumer
    accepts bf16 (internal math stays f32)."""
    B, L, H = x.shape
    if out_dtype is None:
        out_dtype = jnp.float32
    out_dtype = jnp.dtype(out_dtype)

    rows = B * L
    h_pad = ((H + 127) // 128) * 128  # lane-dense last dim -> unmasked stores

    x2d = x.reshape(rows, H)  # wrapper-side reshape: free layout plumbing
    w2d = weight.reshape(1, H).astype(jnp.float32)
    if h_pad != H:
        x2d = jnp.pad(x2d, ((0, 0), (0, h_pad - H)))  # zeros: don't bias sums
        w2d = jnp.pad(w2d, ((0, 0), (0, h_pad - H)))  # zeros: padded out = 0

    x_bytes = jnp.dtype(x.dtype).itemsize
    o_bytes = out_dtype.itemsize
    tm = _row_tile(rows, h_pad, x_bytes, o_bytes)
    grid = (pl.cdiv(rows, tm),)

    # VMEM reservation from actual footprint (+~25% headroom), clamped to the
    # v7x scoped default (32 MiB) and floored at 4 MiB for compiler scratch.
    footprint = 2 * tm * h_pad * (x_bytes + o_bytes) + h_pad * 4
    body_scratch = 2 * tm * h_pad * 4
    vmem_limit = min(max(int((footprint + body_scratch) * 1.25), 4 << 20), 32 << 20)

    out = pl.pallas_call(
        _make_kernel(H),
        out_shape=jax.ShapeDtypeStruct((rows, h_pad), out_dtype),
        grid_spec=pltpu.PrefetchScalarGridSpec(
            num_scalar_prefetch=0,
            grid=grid,
            in_specs=[
                pl.BlockSpec((tm, h_pad), lambda i: (i, 0)),  # streamed x tiles
                pl.BlockSpec((1, h_pad), lambda i: (0, 0)),   # resident weight
            ],
            out_specs=pl.BlockSpec((tm, h_pad), lambda i: (i, 0)),
        ),
        compiler_params=pltpu.CompilerParams(
            dimension_semantics=("parallel",),  # megacore sharding on v7x
            vmem_limit_bytes=vmem_limit,
        ),
        cost_estimate=pl.CostEstimate(
            flops=8 * rows * h_pad,
            transcendentals=rows,  # one rsqrt per row
            bytes_accessed=rows * h_pad * (x_bytes + o_bytes) + h_pad * 4,
        ),
    )(x2d, w2d)

    if h_pad != H:
        out = out[:, :H]
    return out.reshape(B, L, H)


def reference(x, weight):
    xf = x.astype(jnp.float32)
    mean = xf.mean(-1, keepdims=True)
    var = ((xf - mean) ** 2).mean(-1, keepdims=True)
    xn = (xf - mean) / jnp.sqrt(var + _EPS)
    return xn * weight[None, None, :]


if __name__ == "__main__":
    B, L, H = 2, 8, 32

    key = jax.random.PRNGKey(0)
    kx, kw = jax.random.split(key, 2)

    x = jax.random.normal(kx, (B, L, H), dtype=jnp.float32)
    # torch init is ones; perturb slightly so the scale path is exercised
    weight = jnp.ones((H,), jnp.float32) + 0.01 * jax.random.normal(
        kw, (H,), jnp.float32
    )

    out = layer_norm(x, weight)
    jax.block_until_ready(out)

    ref = reference(x, weight)
    assert out.shape == (B, L, H)
    assert out.dtype == jnp.float32
    assert jnp.allclose(out, ref, atol=2e-5, rtol=2e-5), "mismatch vs reference"

    print("KERNEL_OK")
</pallas_src>

<mosaic_0001>
module attributes {stable_mosaic.version = 11 : i64} {
  func.func @layernorm_kernel(%arg0: i32, %arg1: memref<8x128xf32, #tpu.memory_space<vmem>>, %arg2: memref<1x128xf32, #tpu.memory_space<vmem>>, %arg3: memref<8x128xf32, #tpu.memory_space<vmem>>) attributes {dimension_semantics = [#tpu.dimension_semantics<parallel>], iteration_bounds = array<i64: 2>, scalar_prefetch = 0 : i64, scratch_operands = 0 : i64, tpu.core_type = #tpu.core_type<tc>, window_params = [{transform_indices = @transform_0, window_bounds = array<i64: 8, 128>}, {pipeline_mode = #tpu.pipeline_mode<synchronous>, transform_indices = @transform_1, window_bounds = array<i64: 1, 128>}, {transform_indices = @transform_2, window_bounds = array<i64: 8, 128>}]} {
    %c0 = arith.constant 0 : index
    %c0_0 = arith.constant 0 : index
    %0 = vector.load %arg1[%c0, %c0_0] : memref<8x128xf32, #tpu.memory_space<vmem>>, vector<8x128xf32>
    %cst = arith.constant dense<0.000000e+00> : vector<8xf32>
    %1 = vector.multi_reduction <add>, %0, %cst [1] : vector<8x128xf32> to vector<8xf32>
    %2 = vector.shape_cast %1 : vector<8xf32> to vector<8x1xf32>
    %3 = arith.mulf %0, %0 : vector<8x128xf32>
    %cst_1 = arith.constant dense<0.000000e+00> : vector<8xf32>
    %4 = vector.multi_reduction <add>, %3, %cst_1 [1] : vector<8x128xf32> to vector<8xf32>
    %5 = vector.shape_cast %4 : vector<8xf32> to vector<8x1xf32>
    %cst_2 = arith.constant 3.125000e-02 : f32
    %6 = vector.broadcast %cst_2 : f32 to vector<8x1xf32>
    %7 = arith.mulf %2, %6 : vector<8x1xf32>
    %cst_3 = arith.constant 3.125000e-02 : f32
    %8 = vector.broadcast %cst_3 : f32 to vector<8x1xf32>
    %9 = arith.mulf %5, %8 : vector<8x1xf32>
    %10 = arith.mulf %7, %7 : vector<8x1xf32>
    %11 = arith.subf %9, %10 : vector<8x1xf32>
    %cst_4 = arith.constant 0.000000e+00 : f32
    %12 = vector.broadcast %cst_4 : f32 to vector<8x1xf32>
    %13 = arith.maximumf %11, %12 : vector<8x1xf32>
    %14 = vector.broadcast %7 : vector<8x1xf32> to vector<8x128xf32>
    %15 = arith.subf %0, %14 : vector<8x128xf32>
    %cst_5 = arith.constant 9.99999974E-6 : f32
    %16 = vector.broadcast %cst_5 : f32 to vector<8x1xf32>
    %17 = arith.addf %13, %16 : vector<8x1xf32>
    %18 = math.rsqrt %17 : vector<8x1xf32>
    %19 = vector.broadcast %18 : vector<8x1xf32> to vector<8x128xf32>
    %20 = arith.mulf %15, %19 : vector<8x128xf32>
    %c0_6 = arith.constant 0 : index
    %c0_7 = arith.constant 0 : index
    %21 = vector.load %arg2[%c0_6, %c0_7] : memref<1x128xf32, #tpu.memory_space<vmem>>, vector<1x128xf32>
    %22 = vector.broadcast %21 : vector<1x128xf32> to vector<8x128xf32>
    %23 = arith.mulf %20, %22 : vector<8x128xf32>
    %c0_8 = arith.constant 0 : index
    %c0_9 = arith.constant 0 : index
    %24 = vector.load %arg3[%c0_8, %c0_9] : memref<8x128xf32, #tpu.memory_space<vmem>>, vector<8x128xf32>
    tpu.vector_store %arg3[%c0_8, %c0_9], %23 {strides = array<i32>} : memref<8x128xf32, #tpu.memory_space<vmem>>, vector<8x128xf32>,
    return
  }
  func.func @transform_0(%arg0: i32) -> (i32, i32) {
    %c0_i32 = arith.constant 0 : i32
    %c0_i32_0 = arith.constant 0 : i32
    return %arg0, %c0_i32 : i32, i32
  }
  func.func @transform_1(%arg0: i32) -> (i32, i32) {
    %c0_i32 = arith.constant 0 : i32
    %c0_i32_0 = arith.constant 0 : i32
    %c0_i32_1 = arith.constant 0 : i32
    return %c0_i32, %c0_i32_0 : i32, i32
  }
  func.func @transform_2(%arg0: i32) -> (i32, i32) {
    %c0_i32 = arith.constant 0 : i32
    %c0_i32_0 = arith.constant 0 : i32
    return %arg0, %c0_i32 : i32, i32
  }
}

</mosaic_0001>

<bundles_post_ra>
// kernel: tpu_custom_call.1
= control target key start
LH: loop header
LB: loop body
LE: loop exit
PB: predicated region body
PF: predicated region fallthrough
CT: control target
= control target key end

     0   :  { %7 = vsyncpa [#allocation3], 0  ;;  %s583_s0 = inlined_call_operand.hbm [shape: f32[16,128], index: 0, kind: input, shape index: {}]   ;;  %s584_s1 = inlined_call_operand.vmem [shape: f32[1,128], index: 1, kind: input, shape index: {}]   ;;  %s585_s2 = inlined_call_operand.hbm [shape: f32[16,128], index: 2, kind: output, shape index: {}]  }
   0x1   :  { %9 = vsyncpa [#allocation3 + $0x1], 0 }
   0x2   :  { %10 = vsyncpa [#allocation4], 0 }
   0x3   :  { %12 = vsyncpa [#allocation4 + $0x1], 0  ;;  %s439_s9 = smov 0   ;;  %s441_s10 = smov 0  }
   0x4   :  { %s443_s11 = smov 0   ;;  %s445_s12 = smov 0  }
   0x5 LB: > { %s460_s13 = sadd.s32 4294967295, %s420_s12   ;;  %s267_s14 = sadd.s32 4294967294, %s420_s12   ;;  %s420_s12 = sphi %s445_s12, %s602_s12   ;;  %s416_s11 = sphi %s443_s11, %s601_s11   ;;  %s412_s10 = sphi %s441_s10, %s600_s10   ;;  %s408_s9 = sphi %s439_s9, %s599_s9  }
   0x6   : > { %s464_s15 = sadd.s32 1, %s420_s12   ;;  %s25_s16 = sadd.s32 1, %s416_s11 }
   0x7   : > { %s22_s17 = ssub.s32 %s420_s12, %s464_s15  ;;  %p32_p0 = scmp.ne.s32.totalorder %s416_s11, %s412_s10 }
   0x8   : > { %p23_p1 = scmp.eq.s32.totalorder %s22_s17, 0  ;;  %p33_p2 = scmp.eq.s32.totalorder %s420_s12, 0 }
   0x9   : > { %p38_p3 = scmp.ne.s32.totalorder %s412_s10, %s408_s9  ;;  %p39_p4 = scmp.eq.s32.totalorder %s460_s13, 0 }
   0xa   : > { %s476_s18 = scalar_select %p23_p1, %s416_s11, %s25_s16  }
   0xb   : > { %p478_p5 = por %p33_p2, %p32_p0  ;;  %p482_p6 = por %p39_p4, %p38_p3 }
   0xc   : > { %p83_p7 = scmp.eq.s32.totalorder %s460_s13, 1  ;;  %p89_p8 = scmp.eq.s32.totalorder %s267_s14, 1 }
   0xd   : > { %s589_s20 = scalar_select %p482_p6, 1, 0 }
   0xe   : > { %p292_p10 = scmp.lt.s32.totalorder %s420_s12, 2  ;;  %p489_p11 = por %p83_p7, %p32_p0 }
   0xf   : > { %p493_p12 = por %p89_p8, %p38_p3  ;;  %s112_s23 = sand.u32 1, %s416_s11  }
  0x10   : > { %s590_s21 = scalar_select %p489_p11, 1, 0 }
  0x11   : > { %s591_s22 = scalar_select %p493_p12, 1, 0 }
  0x12   : > { %s271_s24 = sshll.u32 %s420_s12, 7  ;;  %s270_s25 = sshll.u32 %s112_s23, 3 }
  0x13   : > { %s502_s28 = scalar_lea.hbm %s583_s0, %s271_s24  ;;  %s116_s29 = scalar_lea.vmem [#allocation2], %s270_s25 }
  0x14   : > { %s123_s30 = sshll.u32 %s116_s29, 4  ;;  %p506_p13 = pnand %p292_p10, %p478_p5  ;;  %s510_s30 = int_to_ptr.vmem [resolvable:$true] %s123_s30 }
  0x15   : > { %s113_s4 = scalar_lea.sflag [#allocation3], %s112_s23  ;;  %s328_s5 = scalar_lea.hbm %s502_s28, 128 }
  0x16   : > { %p329_p2 = scmp.ne.s32.totalorder %s502_s28, %s328_s5  ;;  %p330_p3 = pneg %p506_p13 }
  0x17   : > { %s333_s8 = scalar_lea.hbm %s583_s0, 256  ;;  %p334_p5 = scmp.lt.s32.totalorder %s502_s28, %s583_s0 }
  0x18   : > { %p331_p4 = pnand %p330_p3, %p329_p2  ;;  %p335_p8 = scmp.lt.s32.totalorder %s333_s8, %s328_s5 }
  0x1a   : > { %p332_p7 = pneg %p331_p4  ;;  %p336_p10 = por %p335_p8, %p334_p5 }
  0x1c   : > { %p337_p9 = pnand %p336_p10, %p332_p7 }
  0x1e   : > { %340 = shalt.err (!%p337_p9)
}
  0x1f   : > { %s341_s17 = scalar_lea.vmem %s510_s30, 128  ;;  %s422_s19 = smov [#allocation2]  }
  0x20   : > { %p342_p0 = scmp.ne.s32.totalorder %s510_s30, %s341_s17  ;;  %s346_s23 = sshll.u32 %s422_s19, 4  ;;  %s347_s23 = int_to_ptr.vmem [resolvable:$false] %s346_s23 }
  0x21   : > { %s348_s24 = scalar_lea.vmem %s347_s23, 256  ;;  %p349_p4 = scmp.lt.s32.totalorder %s510_s30, %s347_s23 }
  0x22   : > { %p344_p1 = pnand %p342_p0, %p330_p3  ;;  %p350_p12 = scmp.lt.s32.totalorder %s348_s24, %s341_s17 }
  0x24   : > { %p345_p2 = pneg %p344_p1  ;;  %p351_p11 = por %p350_p12, %p349_p4 }
  0x26   : > { %p352_p6 = pnand %p351_p11, %p345_p2 }
  0x28   : > { %355 = shalt.err (!%p352_p6)
}
  0x29   : > { %287 = dma.hbm_to_vmem [thread:$0]  (!%p506_p13), %s502_s28, 128, %s510_s30, %s113_s4  }
  0x2a   : > { %p593_p9 = scmp.lt.s32.totalorder %s420_s12, 3  ;;  %p594_p7 = scmp.ge.s32.totalorder %s420_s12, 1 }
  0x2c   : > { %p129_p0 = pnand %p594_p7, %p593_p9 }
  0x2d   : > { %s537_s25 = sand.u32 (!%p129_p0), 1, %s412_s10   ;;  %p595_p6 = scmp.ne.s32.totalorder (!%p129_p0), %s589_s20, 0 }
  0x2e   : > { %132 = sbr.rel (%p129_p0) target bundleno = 234 (0xea), region = 28  ;;  %s273_s26 = sshll.u32 (!%p129_p0), %s537_s25, 3 }
  0x2f   : > { %s135_s27 = scalar_lea.sflag (!%p129_p0), [#allocation3], %s537_s25  ;;  %s138_s29 = scalar_lea.vmem (!%p129_p0), [#allocation2], %s273_s26 }
  0x33   : > { %399 = dma.done.wait (%p595_p6), %s135_s27, 128  }
  0x34   : > { %401 = vsyncadd (%p595_p6), %s135_s27, 4294967168  ;;  %v159_v0 = vld [vmem:[%s138_s29] sm:$0xff]  ;;  %s277_s30 = sshll.u32 %s460_s13, 7  ;;  %s158_s3 = scalar_lea.vmem [#allocation5], %s273_s26 }
  0x35   : > { %160 = vadd.xlane.f32.xlu0 %v159_v0  ;;  %v162_v1 = vmul.f32 %v159_v0, %v159_v0  ;;  %v275_v12 = vld [vmem:[%s584_s1] ss:$0 sm:$0xff]  ;;  %s197_s4 = sshll.u32 %s158_s3, 4  ;;  %s195_s7 = scalar_lea.hbm %s585_s2, %s277_s30  ;;  %s198_s4 = int_to_ptr.vmem [resolvable:$true] %s197_s4 }
  0x36   : > { %s184_s8 = scalar_lea.sflag [#allocation4], %s537_s25  ;;  %s356_s14 = scalar_lea.vmem %s198_s4, 128 }
  0x37   : > { %p357_p11 = scmp.ne.s32.totalorder %s198_s4, %s356_s14  ;;  %p596_p12 = scmp.ne.s32.totalorder %s590_s21, 0 }
  0x38   : > { %s423_s16 = smov [#allocation5]  }
  0x39   : > { %163 = vadd.xlane.f32.xlu0 %v162_v1  ;;  %p358_p13 = pnand %p357_p11, %p596_p12  ;;  %s360_s17 = sshll.u32 %s423_s16, 4  ;;  %s361_s17 = int_to_ptr.vmem [resolvable:$false] %s360_s17 }
  0x3a   : > { %s362_s13 = scalar_lea.vmem %s361_s17, 256  ;;  %p363_p3 = scmp.lt.s32.totalorder %s198_s4, %s361_s17 }
  0x3b   : > { %p359_p1 = pneg %p358_p13  ;;  %p364_p5 = scmp.lt.s32.totalorder %s362_s13, %s356_s14 }
  0x3d   : > { %p365_p8 = por %p364_p5, %p363_p3 }
  0x3f   : > { %p366_p10 = pnand %p365_p8, %p359_p1 }
  0xbe   : > { %v161_v2 = vpop.xlane.xlu0 %160 }
  0xbf   : > { %v165_v3 = vmul.f32 0.03125, %v161_v2 }
  0xc1   : > { %v167_v5 = vmul.f32 %v165_v3, %v165_v3  ;;  %v170_v10 = vsub.f32 %v159_v0, %v165_v3 }
  0xc2   : > { %v164_v4 = vpop.xlane.xlu0 %163 }
  0xc3   : > { %v166_v6 = vmul.f32 0.03125, %v164_v4 }
  0xc5   : > { %v168_v7 = vsub.f32 %v166_v6, %v167_v5 }
  0xc7   : > { %v169_v8 = vmax.f32 %v168_v7, 0.0 }
  0xc9   : > { %v171_v9 = vadd.f32 1e-05, %v169_v8 }
  0xcb   : > { %326 = vrsqrt.f32 %v171_v9 }
  0xd8   : > { %v327_v11 = vpop.eup %326 }
  0xd9   : > { %v173_v13 = vmul.f32 %v327_v11, %v170_v10 }
  0xdb   : > { %v181_v14 = vmul.f32 %v275_v12, %v173_v13 }
  0xdd   : > { %182 = vst [vmem:[%s158_s3] sm:$0xff] %v181_v14 }
  0xde   : > { %369 = shalt.err (!%p366_p10)
}
  0xdf   : > { %s370_s19 = scalar_lea.hbm %s195_s7, 128  ;;  %s374_s25 = scalar_lea.hbm %s585_s2, 256 }
  0xe0   : > { %p371_p2 = scmp.ne.s32.totalorder %s195_s7, %s370_s19  ;;  %p375_p7 = scmp.lt.s32.totalorder %s195_s7, %s585_s2 }
  0xe1   : > { %p376_p0 = scmp.lt.s32.totalorder %s374_s25, %s370_s19 }
  0xe2   : > { %p372_p4 = pnand %p371_p2, %p596_p12 }
  0xe3   : > { %p377_p6 = por %p376_p0, %p375_p7 }
  0xe4   : > { %p373_p9 = pneg %p372_p4 }
  0xe6   : > { %p378_p11 = pnand %p377_p6, %p373_p9 }
  0xe8   : > { %381 = shalt.err (!%p378_p11)
}
  0xe9   : > { %282 = dma.vmem_to_hbm [thread:$0]  (%p596_p12), %s198_s4, 128, %s195_s7, %s184_s8  }
  0xea PF: > { %s209_s29 = sand.u32 1, %s408_s9   ;;  %p597_p13 = scmp.ne.s32.totalorder %s591_s22, 0 }
  0xeb   : > { %p598_p1 = scmp.ge.s32.totalorder %s420_s12, 2  ;;  %s210_s20 = scalar_lea.sflag [#allocation4], %s209_s29 }
  0xed   : > { %p289_p3 = pnand %p598_p1, %p597_p13 }
  0xef   : > { %p290_p5 = pneg %p289_p3 }
  0xf1   : > { %403 = dma.done.wait (%p290_p5), %s210_s20, 128  }
  0xf2   : > { %405 = vsyncadd (%p290_p5), %s210_s20, 4294967168  ;;  %p15_p8 = scmp.ge.s32.totalorder %s464_s15, 4   ;;  %s599_s9 = smov %s412_s10 }
  0xf3   : > { %s600_s10 = smov %s416_s11  ;;  %s601_s11 = smov %s476_s18 }
  0xf4   : > { %s602_s12 = smov %s464_s15  ;;  %17 = sbr.rel (!%p15_p8) target bundleno = 5 (0x5), region = 73 }
  0xf9   :  { %215 = vsyncpa [#allocation3], 1 }
  0xfa   :  { %217 = vsyncpa [#allocation3 + $0x1], 1 }
  0xfb   :  { %218 = vsyncpa [#allocation4], 1 }
  0xfc   :  { %220 = vsyncpa [#allocation4 + $0x1], 1 }

</bundles_post_ra>
